<compile_context>
chip_gen: v5e
topology: v5e:2x2
jax: 0.10.0
libtpu: 0.0.40
codegen_flags: <defaults>
</compile_context>

<pallas_src>
import functools

import jax
import jax.numpy as jnp
from jax import lax
from jax.experimental import pallas as pl
from jax.experimental.pallas import tpu as pltpu


def _cdiv(a, b):
    return -(-a // b)


def _round_up(a, b):
    return _cdiv(a, b) * b


def _sublane(itemsize):
    # sublane packing quantum: 8 for f32, 16 for bf16, 32 for int8/fp8
    return max(8, 32 // int(itemsize))


def _vmem_limit_bytes():
    try:
        cap = int(pltpu.get_tpu_info().vmem_capacity_bytes)
    except Exception:
        cap = 64 << 20                     # conservative (v7x per-TC VMEM)
    return max(cap // 2, 16 << 20)


def _pick_rows(R, L, itemsize, sub, target_bytes=2 << 20):
    """Row-block size (sublane axis) for the flattened (N*C, L) layout."""
    if R <= sub:
        return R                           # full dim: always a legal block
    rows = max(target_bytes // max(L * itemsize, 1), sub)
    # keep >= 2 row blocks so both v7x TensorCores get stats/normalize work
    rows = min(rows, max(((R // 2) // sub) * sub, sub))
    rows = min(rows, (R // sub) * sub)
    return int(max((rows // sub) * sub, sub))


def _pick_tl(L, cap_elems):
    """Largest lane-dense spatial tile within `cap_elems` lanes of budget."""
    if cap_elems >= L or L <= 128:
        return L                           # full row: one contiguous DMA
    cap = max((cap_elems // 128) * 128, 128)
    # Prefer a large 128-multiple exact divisor of L (no masked boundary), but
    # only if big enough that per-grid-step overhead stays negligible.
    floor_t = max(cap // 2, 2048)
    t = min((L // 128) * 128, cap)
    while t >= floor_t:
        if L % t == 0:
            return t
        t -= 128
    # Balanced tiling with a masked boundary block.
    nblk = _cdiv(L, cap)
    return min(_round_up(_cdiv(L, nblk), 128), cap)


def _fused_kernel(x_ref, w_ref, b_ref, rm_ref, rv_ref, o_ref, *, alpha, eps,
                  count):
    """Whole tensor resident in VMEM: stats + mix + normalize in one pass."""
    x = x_ref[...].astype(jnp.float32)                          # (N, C, L)
    s = jnp.sum(jnp.sum(x, axis=-1, keepdims=True), axis=0, keepdims=True)
    q = jnp.sum(jnp.sum(x * x, axis=-1, keepdims=True), axis=0, keepdims=True)
    mean = s * (1.0 / count)                                    # (1, C, 1)
    denom = max(count - 1.0, 1.0)                               # ddof=1 guard
    var = jnp.maximum((q - count * mean * mean) / denom, 0.0)
    r_mean = (1.0 - alpha) * rm_ref[...] + alpha * mean
    r_var = (1.0 - alpha) * rv_ref[...] + alpha * var
    inv = lax.rsqrt(r_var + eps)
    scale = w_ref[...] * inv
    shift = b_ref[...] - r_mean * scale
    o_ref[...] = (x * scale + shift).astype(o_ref.dtype)


def _stats_kernel(x_ref, psum_ref, psq_ref, *, L, tl, need_mask):
    """Pass 1: per-row sum / sumsq over lane tiles; resident accumulators."""
    l = pl.program_id(1)
    n_lt = pl.num_programs(1)

    @pl.when(l == 0)
    def _():
        psum_ref[...] = jnp.zeros_like(psum_ref)
        psq_ref[...] = jnp.zeros_like(psq_ref)

    x = x_ref[...].astype(jnp.float32)                          # (ROWS, tl)

    if need_mask:
        # Only the last spatial tile pays the iota/compare/select cost.
        @pl.when(l != n_lt - 1)
        def _():
            psum_ref[...] += jnp.sum(x, axis=-1, keepdims=True)
            psq_ref[...] += jnp.sum(x * x, axis=-1, keepdims=True)

        @pl.when(l == n_lt - 1)
        def _():
            lane = lax.broadcasted_iota(jnp.int32, x.shape, dimension=1)
            xm = jnp.where(lane < (L - l * tl), x, 0.0)
            psum_ref[...] += jnp.sum(xm, axis=-1, keepdims=True)
            psq_ref[...] += jnp.sum(xm * xm, axis=-1, keepdims=True)
    else:
        psum_ref[...] += jnp.sum(x, axis=-1, keepdims=True)
        psq_ref[...] += jnp.sum(x * x, axis=-1, keepdims=True)


def _norm_kernel(x_ref, scale_ref, shift_ref, o_ref):
    """Pass 2: y = x * scale + shift (per-row, broadcast across lanes)."""
    x = x_ref[...].astype(jnp.float32)                          # (ROWS, tl)
    o_ref[...] = (x * scale_ref[...] + shift_ref[...]).astype(o_ref.dtype)


def alpha_batch_norm(x, weight, bias, running_mean, running_var, alpha,
                     eps=1e-5, *, donate_input=False, force_two_pass=False,
                     force_tl=None, force_rows=None):
    """x: (N, C, H, W). Returns y of the same shape/dtype."""
    N, C, H, W = x.shape
    L = H * W
    R = N * C
    itemsize = int(jnp.dtype(x.dtype).itemsize)
    sub = _sublane(itemsize)
    vmem_limit = _vmem_limit_bytes()
    f32 = lambda a: jnp.asarray(a, jnp.float32)
    alpha = float(alpha)
    eps = float(eps)
    count = float(N * L)
    denom = max(count - 1.0, 1.0)
    alias = {0: 0} if donate_input else {}

    # ---- fused single-pass fast path: whole (padded) tensor in VMEM --------
    fused_bytes = (2 * N * _round_up(C, sub) * L * itemsize       # in + out
                   + 4 * N * _round_up(C, 8) * L * 4)             # f32 temps
    if (not force_two_pass) and fused_bytes <= int(0.7 * vmem_limit):
        params = [f32(p).reshape(1, C, 1)
                  for p in (weight, bias, running_mean, running_var)]
        y = pl.pallas_call(
            functools.partial(_fused_kernel, alpha=alpha, eps=eps,
                              count=count),
            out_shape=jax.ShapeDtypeStruct((N, C, L), x.dtype),
            input_output_aliases=alias,
            compiler_params=pltpu.CompilerParams(
                vmem_limit_bytes=vmem_limit),
        )(x.reshape(N, C, L), *params)
        return y.reshape(N, C, H, W)

    # ---- two-pass path on x flattened to (N*C, L) ---------------------------
    x2d = x.reshape(R, L)                        # free: no data movement
    rows = int(force_rows) if force_rows else _pick_rows(R, L, itemsize, sub)
    rows_pad = _round_up(rows, sub)
    n_rt = _cdiv(R, rows)

    budget = int(0.6 * vmem_limit)
    cap1 = max(budget // (2 * rows_pad * itemsize), 128)   # pass 1: 2 in bufs
    cap2 = max(budget // (4 * rows_pad * itemsize), 128)   # pass 2: 2 in + 2 out
    tl1 = min(int(force_tl), L) if force_tl else _pick_tl(L, cap1)
    tl2 = min(int(force_tl), L) if force_tl else _pick_tl(L, cap2)

    # ---- pass 1: per-row partial sums (lane reduce; row axis parallel) -----
    n_lt1 = _cdiv(L, tl1)
    x_spec1 = pl.BlockSpec((rows, tl1), lambda r, l: (r, l))
    stat_spec = pl.BlockSpec((rows, 1), lambda r, l: (r, 0))
    psum, psq = pl.pallas_call(
        functools.partial(_stats_kernel, L=L, tl=tl1,
                          need_mask=(L % tl1) != 0),
        out_shape=(jax.ShapeDtypeStruct((R, 1), jnp.float32),
                   jax.ShapeDtypeStruct((R, 1), jnp.float32)),
        grid_spec=pltpu.PrefetchScalarGridSpec(
            num_scalar_prefetch=0,
            grid=(n_rt, n_lt1),
            in_specs=[x_spec1],
            out_specs=(stat_spec, stat_spec)),
        compiler_params=pltpu.CompilerParams(
            dimension_semantics=("parallel", "arbitrary"),
            vmem_limit_bytes=vmem_limit),
    )(x2d)

    # ---- tiny C-length epilogue: fold stats into per-channel scale/shift ---
    bsum = jnp.sum(psum.reshape(N, C), axis=0)
    bsq = jnp.sum(psq.reshape(N, C), axis=0)
    batch_mean = bsum / count
    # Unbiased variance (matches BatchNorm2d running_var with momentum=1.0);
    # clamp because E[x^2] - mean^2 can go slightly negative in f32.
    # TODO(synk): for inputs with |mean| >> std, a centered second reduction
    # would be more accurate than E[x^2] - mean^2.
    batch_var = jnp.maximum((bsq - count * batch_mean * batch_mean) / denom,
                            0.0)
    r_mean = (1.0 - alpha) * f32(running_mean) + alpha * batch_mean
    r_var = (1.0 - alpha) * f32(running_var) + alpha * batch_var
    inv = lax.rsqrt(r_var + eps)
    scale_c = f32(weight) * inv
    shift_c = f32(bias) - r_mean * scale_c
    scale_r = jnp.broadcast_to(scale_c[None, :], (N, C)).reshape(R, 1)
    shift_r = jnp.broadcast_to(shift_c[None, :], (N, C)).reshape(R, 1)

    # ---- pass 2: lane-dense elementwise normalize ---------------------------
    n_lt2 = _cdiv(L, tl2)
    x_spec2 = pl.BlockSpec((rows, tl2), lambda r, l: (r, l))
    ss_spec = pl.BlockSpec((rows, 1), lambda r, l: (r, 0))
    y2d = pl.pallas_call(
        _norm_kernel,
        out_shape=jax.ShapeDtypeStruct((R, L), x.dtype),
        grid_spec=pltpu.PrefetchScalarGridSpec(
            num_scalar_prefetch=0,
            grid=(n_rt, n_lt2),
            in_specs=[x_spec2, ss_spec, ss_spec],
            out_specs=x_spec2),
        input_output_aliases=alias,
        compiler_params=pltpu.CompilerParams(
            dimension_semantics=("parallel", "parallel"),
            vmem_limit_bytes=vmem_limit),
    )(x2d, scale_r, shift_r)
    return y2d.reshape(N, C, H, W)


def _reference(x, weight, bias, running_mean, running_var, alpha, eps=1e-5):
    x = x.astype(jnp.float32)
    bm = x.mean(axis=(0, 2, 3))
    bv = x.var(axis=(0, 2, 3), ddof=1)
    m = (1.0 - alpha) * running_mean + alpha * bm
    v = (1.0 - alpha) * running_var + alpha * bv
    m = m[None, :, None, None]
    v = v[None, :, None, None]
    w = weight[None, :, None, None]
    b = bias[None, :, None, None]
    return (x - m) / jnp.sqrt(v + eps) * w + b


if __name__ == "__main__":
    key = jax.random.PRNGKey(0)
    kx, kw, kb, km, kv, kx2 = jax.random.split(key, 6)

    C = 4
    alpha = 0.3
    eps = 1e-5
    # Deterministic synthetic BatchNorm2d(num_features=C) parameters/buffers.
    weight = jax.random.normal(kw, (C,), dtype=jnp.float32) * 0.5 + 1.0
    bias = jax.random.normal(kb, (C,), dtype=jnp.float32) * 0.1
    running_mean = jax.random.normal(km, (C,), dtype=jnp.float32) * 0.2
    running_var = jax.random.uniform(kv, (C,), dtype=jnp.float32,
                                     minval=0.5, maxval=1.5)

    def check(xin, tol, **kw):
        y = jax.block_until_ready(
            alpha_batch_norm(xin, weight, bias, running_mean, running_var,
                             alpha, eps, **kw))
        y_ref = _reference(xin, weight, bias, running_mean, running_var,
                           alpha, eps)
        assert y.shape == xin.shape and y.dtype == xin.dtype
        err = float(jnp.max(jnp.abs(y.astype(jnp.float32) - y_ref)))
        assert err < tol, f"mismatch vs reference: {err}"

    x = jax.random.normal(kx, (2, C, 16, 16), dtype=jnp.float32) * 2.0 + 0.5

    # 1) fused single-pass path (whole tensor resident in VMEM)
    check(x, 1e-4)
    # 2) two-pass flattened (N*C, L) path with full-row spatial tiles
    check(x, 1e-4, force_two_pass=True)
    # 3) two-pass path exercising the masked boundary tile (L=144, tl=128)
    x2 = jax.random.normal(kx2, (2, C, 12, 12), dtype=jnp.float32) * 2.0 + 0.5
    check(x2, 1e-4, force_two_pass=True, force_tl=128)
    # 4) bf16 input through the fused path (output quantization tolerance)
    check(x.astype(jnp.bfloat16), 5e-2)

    print("KERNEL_OK")
</pallas_src>

<mosaic_0001>
module attributes {stable_mosaic.version = 11 : i64} {
  func.func @_fused_kernel(%arg0: memref<2x4x256xf32, #tpu.memory_space<vmem>>, %arg1: memref<1x4x1xf32, #tpu.memory_space<vmem>>, %arg2: memref<1x4x1xf32, #tpu.memory_space<vmem>>, %arg3: memref<1x4x1xf32, #tpu.memory_space<vmem>>, %arg4: memref<1x4x1xf32, #tpu.memory_space<vmem>>, %arg5: memref<2x4x256xf32, #tpu.memory_space<vmem>>) attributes {dimension_semantics = [], scalar_prefetch = 0 : i64, scratch_operands = 0 : i64, tpu.core_type = #tpu.core_type<tc>} {
    %c0 = arith.constant 0 : index
    %c0_0 = arith.constant 0 : index
    %c0_1 = arith.constant 0 : index
    %0 = vector.load %arg0[%c0, %c0_0, %c0_1] : memref<2x4x256xf32, #tpu.memory_space<vmem>>, vector<2x4x256xf32>
    %cst = arith.constant dense<0.000000e+00> : vector<2x4xf32>
    %1 = vector.multi_reduction <add>, %0, %cst [2] : vector<2x4x256xf32> to vector<2x4xf32>
    %2 = vector.shape_cast %1 : vector<2x4xf32> to vector<2x4x1xf32>
    %cst_2 = arith.constant dense<0.000000e+00> : vector<4x1xf32>
    %3 = vector.multi_reduction <add>, %2, %cst_2 [0] : vector<2x4x1xf32> to vector<4x1xf32>
    %4 = vector.shape_cast %3 : vector<4x1xf32> to vector<1x4x1xf32>
    %5 = arith.mulf %0, %0 : vector<2x4x256xf32>
    %cst_3 = arith.constant dense<0.000000e+00> : vector<2x4xf32>
    %6 = vector.multi_reduction <add>, %5, %cst_3 [2] : vector<2x4x256xf32> to vector<2x4xf32>
    %7 = vector.shape_cast %6 : vector<2x4xf32> to vector<2x4x1xf32>
    %cst_4 = arith.constant dense<0.000000e+00> : vector<4x1xf32>
    %8 = vector.multi_reduction <add>, %7, %cst_4 [0] : vector<2x4x1xf32> to vector<4x1xf32>
    %9 = vector.shape_cast %8 : vector<4x1xf32> to vector<1x4x1xf32>
    %cst_5 = arith.constant 0.001953125 : f32
    %10 = vector.broadcast %cst_5 : f32 to vector<1x4x1xf32>
    %11 = arith.mulf %4, %10 : vector<1x4x1xf32>
    %cst_6 = arith.constant 5.120000e+02 : f32
    %12 = vector.broadcast %cst_6 : f32 to vector<1x4x1xf32>
    %13 = arith.mulf %12, %11 : vector<1x4x1xf32>
    %14 = arith.mulf %13, %11 : vector<1x4x1xf32>
    %15 = arith.subf %9, %14 : vector<1x4x1xf32>
    %cst_7 = arith.constant 5.110000e+02 : f32
    %16 = vector.broadcast %cst_7 : f32 to vector<1x4x1xf32>
    %17 = arith.divf %15, %16 : vector<1x4x1xf32>
    %cst_8 = arith.constant 0.000000e+00 : f32
    %18 = vector.broadcast %cst_8 : f32 to vector<1x4x1xf32>
    %19 = arith.maximumf %17, %18 : vector<1x4x1xf32>
    %c0_9 = arith.constant 0 : index
    %c0_10 = arith.constant 0 : index
    %c0_11 = arith.constant 0 : index
    %20 = vector.load %arg3[%c0_9, %c0_10, %c0_11] : memref<1x4x1xf32, #tpu.memory_space<vmem>>, vector<1x4x1xf32>
    %cst_12 = arith.constant 0.699999988 : f32
    %21 = vector.broadcast %cst_12 : f32 to vector<1x4x1xf32>
    %22 = arith.mulf %21, %20 : vector<1x4x1xf32>
    %cst_13 = arith.constant 3.000000e-01 : f32
    %23 = vector.broadcast %cst_13 : f32 to vector<1x4x1xf32>
    %24 = arith.mulf %23, %11 : vector<1x4x1xf32>
    %25 = arith.addf %22, %24 : vector<1x4x1xf32>
    %c0_14 = arith.constant 0 : index
    %c0_15 = arith.constant 0 : index
    %c0_16 = arith.constant 0 : index
    %26 = vector.load %arg4[%c0_14, %c0_15, %c0_16] : memref<1x4x1xf32, #tpu.memory_space<vmem>>, vector<1x4x1xf32>
    %cst_17 = arith.constant 0.699999988 : f32
    %27 = vector.broadcast %cst_17 : f32 to vector<1x4x1xf32>
    %28 = arith.mulf %27, %26 : vector<1x4x1xf32>
    %cst_18 = arith.constant 3.000000e-01 : f32
    %29 = vector.broadcast %cst_18 : f32 to vector<1x4x1xf32>
    %30 = arith.mulf %29, %19 : vector<1x4x1xf32>
    %31 = arith.addf %28, %30 : vector<1x4x1xf32>
    %cst_19 = arith.constant 9.99999974E-6 : f32
    %32 = vector.broadcast %cst_19 : f32 to vector<1x4x1xf32>
    %33 = arith.addf %31, %32 : vector<1x4x1xf32>
    %34 = math.rsqrt %33 : vector<1x4x1xf32>
    %c0_20 = arith.constant 0 : index
    %c0_21 = arith.constant 0 : index
    %c0_22 = arith.constant 0 : index
    %35 = vector.load %arg1[%c0_20, %c0_21, %c0_22] : memref<1x4x1xf32, #tpu.memory_space<vmem>>, vector<1x4x1xf32>
    %36 = arith.mulf %35, %34 : vector<1x4x1xf32>
    %c0_23 = arith.constant 0 : index
    %c0_24 = arith.constant 0 : index
    %c0_25 = arith.constant 0 : index
    %37 = vector.load %arg2[%c0_23, %c0_24, %c0_25] : memref<1x4x1xf32, #tpu.memory_space<vmem>>, vector<1x4x1xf32>
    %38 = arith.mulf %25, %36 : vector<1x4x1xf32>
    %39 = arith.subf %37, %38 : vector<1x4x1xf32>
    %40 = vector.broadcast %36 : vector<1x4x1xf32> to vector<2x4x256xf32>
    %41 = arith.mulf %0, %40 : vector<2x4x256xf32>
    %42 = vector.broadcast %39 : vector<1x4x1xf32> to vector<2x4x256xf32>
    %43 = arith.addf %41, %42 : vector<2x4x256xf32>
    %c0_26 = arith.constant 0 : index
    %c0_27 = arith.constant 0 : index
    %c0_28 = arith.constant 0 : index
    %44 = vector.load %arg5[%c0_26, %c0_27, %c0_28] : memref<2x4x256xf32, #tpu.memory_space<vmem>>, vector<2x4x256xf32>
    tpu.vector_store %arg5[%c0_26, %c0_27, %c0_28], %43 {strides = array<i32>} : memref<2x4x256xf32, #tpu.memory_space<vmem>>, vector<2x4x256xf32>,
    return
  }
}

</mosaic_0001>

<bundles_post_ra>
// kernel: tpu_custom_call.1
= control target key start
LH: loop header
LB: loop body
LE: loop exit
PB: predicated region body
PF: predicated region fallthrough
CT: control target
= control target key end

     0   :  { %10 = vsyncpa [#allocation3], 0  ;;  %s324_s0 = inlined_call_operand.hbm [shape: f32[2,4,256], index: 0, kind: input, shape index: {}]   ;;  %s325_s1 = inlined_call_operand.vmem [shape: f32[1,4,1], index: 1, kind: input, shape index: {}]   ;;  %s326_s2 = inlined_call_operand.vmem [shape: f32[1,4,1], index: 2, kind: input, shape index: {}]   ;;  %s327_s3 = inlined_call_operand.vmem [shape: f32[1,4,1], index: 3, kind: input, shape index: {}]   ;;  %s328_s4 = inlined_call_operand.vmem [shape: f32[1,4,1], index: 4, kind: input, shape index: {}]   ;;  %s329_s5 = inlined_call_operand.hbm [shape: f32[2,4,256], index: 5, kind: output, shape index: {}]  }
   0x1   :  { %11 = vsyncpa [#allocation4], 0  ;;  %s16_s20 = sshll.u32 %s324_s0, 4  ;;  %s239_s21 = smov [#allocation2]   ;;  %s17_s20 = int_to_ptr.hbm [resolvable:$true] %s16_s20 }
   0x2   :  { %s18_s22 = sshll.u32 %s239_s21, 4  ;;  %s240_s23 = smov 128   ;;  %s19_s22 = int_to_ptr.vmem [resolvable:$true] %s18_s22 }
   0x3   :  { %s241_s24 = smov 8  }
   0x4   :  { %24 = dma.hbm_to_vmem [thread:$0]  %s17_s20, 256, %s19_s22, [#allocation3], %s240_s23, %s240_s23, %s241_s24  }
   0x5   :  { %235 = dma.done.wait [#allocation3], 256  }
   0x6   :  { %236 = vsyncadd [#allocation3], 4294967040  ;;  %v282_v0 = vld [vmem:[#allocation2] sm:$0xff]  ;;  %v284_v1 = vld [vmem:[#allocation2 + $0x8] sm:$0xff]  ;;  %vm52_vm0 = vcmask 1043456   ;;  %v242_v24 = vmov 511.0  }
   0x7   :  { %41 = vst [vmem:[#allocation1] ss:$2 sm:$0xff] %v282_v0  ;;  %v66_v2 = vmul.f32 %v282_v0, %v282_v0  ;;  %v67_v3 = vmul.f32 %v284_v1, %v284_v1  ;;  %183 = vrcp.f32 %v242_v24  ;;  %v243_v27 = vmov 0   ;;  %v111_v46 = vld [vmem:[%s328_s4] sm:$0xf]  ;;  %s161_s8 = sshll.u32 %s329_s5, 4  ;;  %s162_s8 = int_to_ptr.hbm [resolvable:$true] %s161_s8 }
   0x8   :  { %45 = vst [vmem:[#allocation1 + $0x10] ss:$2 sm:$0xff] %v284_v1  ;;  %181 = vset.pattern.permute.xlu2 %v243_v27  ;;  %182 = vset.pattern.permute.xlu0 %v243_v27  ;;  %v112_v48 = vmul.f32 0.7, %v111_v46  ;;  %v107_v57 = vld [vmem:[%s327_s3] sm:$0xf] }
   0x9   :  { %v126_v60 = vld [vmem:[%s325_s1] sm:$0xf]  ;;  %v108_v62 = vmul.f32 0.7, %v107_v57  ;;  %s245_s1 = smov [#allocation5]  }
   0xa   :  { %s159_s3 = sshll.u32 %s245_s1, 4  ;;  %s160_s3 = int_to_ptr.vmem [resolvable:$true] %s159_s3 }
   0xd   :  { %v184_v25 = vpop.eup %183 }
   0xe   :  { %v42_v4 = vld.sshfl [vmem:[#allocation1] sm:$0xff pattern:$0x75316420]  ;;  %v43_v5 = vld.sshfl [vmem:[#allocation1 + $0x8] sm:$0xff pattern:$0x75316420]  ;;  %vm103_vm1 = vweird.f32 %v184_v25 }
   0xf   :  { %v53_v6 = vsel %vm52_vm0, %v42_v4, 0.0  ;;  %v54_v7 = vsel %vm52_vm0, %v43_v5, 0.0  ;;  %70 = vst [vmem:[#allocation1] ss:$2 sm:$0xff] %v66_v2  ;;  %v99_v28 = vmul.f32 511.0, %v184_v25 }
  0x10   :  { %v55_v8 = vadd.f32 %v54_v7, %v53_v6  ;;  %v46_v9 = vld.sshfl [vmem:[#allocation1 + $0x10] sm:$0xff pattern:$0x75316420]  ;;  %v47_v10 = vld.sshfl [vmem:[#allocation1 + $0x18] sm:$0xff pattern:$0x75316420] }
  0x11   :  { %74 = vst [vmem:[#allocation1 + $0x10] ss:$2 sm:$0xff] %v67_v3  ;;  %v58_v11 = vsel %vm52_vm0, %v46_v9, 0.0  ;;  %v59_v12 = vsel %vm52_vm0, %v47_v10, 0.0  ;;  %v100_v29 = vsub.f32 1.0, %v99_v28 }
  0x12   :  { %56 = vadd.xlane.f32.xlu0 %v55_v8  ;;  %v60_v15 = vadd.f32 %v59_v12, %v58_v11  ;;  %v128_v5 = vld [vmem:[%s326_s2] sm:$0xf]  ;;  %v244_v7 = vmov 839922192  }
  0x13   :  { %v101_v35 = vmul.f32 %v184_v25, %v100_v29  ;;  %v136_v8 = vunpack.c.l.s4 %v244_v7 }
  0x15   :  { %v102_v38 = vadd.f32 %v184_v25, %v101_v35  ;;  %v137_v10 = vunpack.c.0.s8 %v136_v8 }
  0x16   :  { %v71_v13 = vld.sshfl [vmem:[#allocation1] sm:$0xff pattern:$0x75316420]  ;;  %v72_v14 = vld.sshfl [vmem:[#allocation1 + $0x8] sm:$0xff pattern:$0x75316420] }
  0x17   :  { %v81_v16 = vsel %vm52_vm0, %v71_v13, 0.0  ;;  %v82_v17 = vsel %vm52_vm0, %v72_v14, 0.0  ;;  %v104_v44 = vsel %vm103_vm1, %v184_v25, %v102_v38 }
  0x18   :  { %v83_v18 = vadd.f32 %v82_v17, %v81_v16  ;;  %v75_v19 = vld.sshfl [vmem:[#allocation1 + $0x10] sm:$0xff pattern:$0x75316420]  ;;  %v76_v20 = vld.sshfl [vmem:[#allocation1 + $0x18] sm:$0xff pattern:$0x75316420] }
  0x19   :  { %v86_v21 = vsel %vm52_vm0, %v75_v19, 0.0  ;;  %v87_v22 = vsel %vm52_vm0, %v76_v20, 0.0 }
  0x1a   :  { %84 = vadd.xlane.f32.xlu1 %v83_v18  ;;  %61 = vadd.xlane.f32.xlu0 %v60_v15  ;;  %v88_v23 = vadd.f32 %v87_v22, %v86_v21 }
  0x22   :  { %89 = vadd.xlane.f32.xlu1 %v88_v23 }
  0x85   :  { %v57_v26 = vpop.xlane.xlu0 %56 }
  0x86   :  { %v63_v32 = vsel %vm52_vm0, %v57_v26, 0.0 }
  0x8d   :  { %v85_v30 = vpop.xlane.xlu1 %84  ;;  %v62_v31 = vpop.xlane.xlu0 %61 }
  0x8e   :  { %v64_v33 = vsel %vm52_vm0, %v62_v31, 0.0  ;;  %v91_v40 = vsel %vm52_vm0, %v85_v30, 0.0 }
  0x8f   :  { %v65_v34 = vadd.f32 %v64_v33, %v63_v32 }
  0x91   :  { %v94_v36 = vmul.f32 0.001953125, %v65_v34 }
  0x93   :  { %v95_v37 = vmul.f32 512.0, %v94_v36  ;;  %v109_v61 = vmul.f32 0.3, %v94_v36 }
  0x95   :  { %v90_v39 = vpop.xlane.xlu1 %89  ;;  %v96_v43 = vmul.f32 %v95_v37, %v94_v36  ;;  %v110_v3 = vadd.f32 %v109_v61, %v108_v62 }
  0x96   :  { %v92_v41 = vsel %vm52_vm0, %v90_v39, 0.0 }
  0x97   :  { %v93_v42 = vadd.f32 %v92_v41, %v91_v40 }
  0x99   :  { %v97_v45 = vsub.f32 %v93_v42, %v96_v43 }
  0x9b   :  { %v105_v47 = vmul.f32 %v104_v44, %v97_v45 }
  0x9d   :  { %v106_v49 = vmax.f32 %v105_v47, 0.0 }
  0x9f   :  { %v113_v50 = vmul.f32 0.3, %v106_v49 }
  0xa1   :  { %v114_v51 = vadd.f32 %v113_v50, %v112_v48 }
  0xa3   :  { %v115_v52 = vadd.f32 1e-05, %v114_v51 }
  0xa5   :  { %185 = vrsqrt.f32 %v115_v52  ;;  %vm122_vm3 = vweird.f32 %v115_v52 }
  0xab   :  { %v186_v53 = vpop.eup %185 }
  0xac   :  { %v117_v54 = vmul.f32 %v186_v53, %v115_v52  ;;  %vm123_vm2 = vweird.f32 %v186_v53 }
  0xad   :  { %vm124_vm4 = vmor %vm122_vm3, %vm123_vm2 }
  0xae   :  { %v118_v55 = vmul.f32 %v186_v53, %v117_v54 }
  0xb0   :  { %v119_v56 = vmul.f32 0.5, %v118_v55 }
  0xb2   :  { %v120_v58 = vsub.f32 1.5, %v119_v56 }
  0xb4   :  { %v121_v59 = vmul.f32 %v186_v53, %v120_v58 }
  0xb6   :  { %v125_v63 = vsel %vm124_vm4, %v186_v53, %v121_v59 }
  0xb7   :  { %v127_v2 = vmul.f32 %v126_v60, %v125_v63 }
  0xb9   :  { %133 = vperm.xlu2 %181, %v127_v2   ;;  %v129_v4 = vmul.f32 %v127_v2, %v110_v3 }
  0xbb   :  { %v130_v6 = vsub.f32 %v128_v5, %v129_v4 }
  0xc1   :  { %144 = vperm.xlu2 %181, %v130_v6  }
 0x113   :  { %v134_v9 = vpop.permute.xlu2 %133 }
 0x114   :  { %v138_v11 = vperm.slane %v134_v9, %v137_v10 }
 0x116   :  { %v140_v13 = vmul.f32 %v138_v11, %v282_v0  ;;  %v141_v14 = vmul.f32 %v138_v11, %v284_v1 }
 0x11b   :  { %v145_v12 = vpop.permute.xlu2 %144 }
 0x11c   :  { %v149_v15 = vperm.slane %v145_v12, %v137_v10 }
 0x11e   :  { %v151_v16 = vadd.f32 %v149_v15, %v140_v13  ;;  %v152_v17 = vadd.f32 %v149_v15, %v141_v14 }
 0x120   :  { %153 = vst [vmem:[#allocation5] sm:$0xff] %v151_v16 }
 0x121   :  { %154 = vst [vmem:[#allocation5 + $0x8] sm:$0xff] %v152_v17 }
 0x122   :  { %167 = dma.vmem_to_hbm [thread:$0]  %s160_s3, 256, %s162_s8, [#allocation4], %s240_s23, %s240_s23, %s241_s24  }
 0x123   :  { %237 = dma.done.wait [#allocation4], 256  }
 0x124   :  { %238 = vsyncadd [#allocation4], 4294967040 }
 0x125   :  { %172 = vsyncpa [#allocation3], 1 }
 0x126   :  { %173 = vsyncpa [#allocation4], 1 }

</bundles_post_ra>
